<compile_context>
chip_gen: v7x
topology: tpu7x:2x2x1
jax: 0.10.0
libtpu: 0.0.40
codegen_flags: <defaults>
</compile_context>

<pallas_src>
import jax
import jax.numpy as jnp
import numpy as np
from jax.experimental import pallas as pl
from jax.experimental.pallas import tpu as pltpu


# Logical dims from the PyTorch module.
D_IN, D1, D2, D3, D_OUT = 352, 300, 256, 200, 128
# Lane-padded dims (multiples of 128) used by the kernel.
PD_IN, PD1, PD2, PD3, PD_OUT = 384, 384, 256, 256, 128
NEG_SLOPE = 0.05

TILE_B_MAX = 2048   # double-buffered working set at 2048 rows is < ~12 MiB
SUBLANE = 16        # bf16 sublane packing


def _round_up(n, m):
    return (n + m - 1) // m * m


def _cdiv(a, b):
    return -(-a // b)


def _choose_tile_b(batch):
    b = _round_up(batch, SUBLANE)
    if b <= 2 * SUBLANE:
        return b                     # tiny batch: one small tile
    # At least 2 grid steps (so v7x can split the batch across its 2 TCs) and
    # an even step count for balance; cap the tile at TILE_B_MAX. This also
    # bounds ragged-batch padding to <= ~16 rows per tile (e.g. batch=600 ->
    # 2 tiles of 304 instead of padding to 1024).
    n_tiles = max(2, _cdiv(b, TILE_B_MAX))
    if n_tiles % 2:
        n_tiles += 1
    return _round_up(_cdiv(b, n_tiles), SUBLANE)


def _mlp_kernel(x_ref,
                w1_ref, b1_ref,
                w2_ref, b2_ref,
                w3_ref, b3_ref,
                w4_ref, b4_ref,
                o_ref):
    """One batch tile of the 4-layer MLP (lane-padded feature dims).

    Weight/bias refs are whole-array blocks with constant index_map, so they
    stay resident in VMEM across grid steps. Matmuls run bf16 x bf16 -> f32 on
    the MXU; bias add + LeakyReLU run in f32 on the VPU; inter-layer
    activations are downcast to bf16 to halve their vreg/VMEM footprint.
    """

    def layer(h_bf16, w_ref, b_ref, *, act):
        acc = jnp.dot(h_bf16, w_ref[...],
                      preferred_element_type=jnp.float32) + b_ref[...]
        if act:
            acc = jnp.where(acc >= 0, acc, NEG_SLOPE * acc)
        return acc

    h = x_ref[...]                                            # bf16 (tile_b, 384)
    h = layer(h, w1_ref, b1_ref, act=True).astype(jnp.bfloat16)   # D01+Dropout(eval)+LReLU
    h = layer(h, w2_ref, b2_ref, act=True).astype(jnp.bfloat16)   # D02+Dropout(eval)+LReLU
    h = layer(h, w3_ref, b3_ref, act=True).astype(jnp.bfloat16)   # D03+LReLU
    o_ref[...] = layer(h, w4_ref, b4_ref, act=False).astype(o_ref.dtype)  # D04


def fully_connect_modul_266_forward(x, params, *, tile_b=None):
    """x: (batch, 352) float32. params: padded weights/biases. Returns (batch, 128) f32."""
    batch = x.shape[0]
    assert x.shape[1] == D_IN

    if tile_b is None:
        tile_b = _choose_tile_b(batch)
    else:
        tile_b = _round_up(tile_b, SUBLANE)

    padded_batch = _round_up(max(batch, tile_b), tile_b)
    # Fuse batch + feature zero-padding with the f32 -> bf16 cast: one HBM read
    # of x, one (smaller) bf16 write. Padded rows produce garbage outputs that
    # are sliced off; padded feature lanes are exact zeros and never leak.
    x_p = jnp.pad(x, ((0, padded_batch - batch),
                      (0, PD_IN - D_IN))).astype(jnp.bfloat16)

    grid = (padded_batch // tile_b,)

    weight_args = (
        params["w1"], params["b1"],
        params["w2"], params["b2"],
        params["w3"], params["b3"],
        params["w4"], params["b4"],
    )

    def resident_spec(a):
        # Whole-array block, constant block index: fetched once, stays in VMEM.
        return pl.BlockSpec(a.shape, lambda i: (0, 0))

    flops = 2 * padded_batch * (PD_IN * PD1 + PD1 * PD2 + PD2 * PD3 + PD3 * PD_OUT)
    bytes_accessed = (
        padded_batch * PD_IN * 2                                   # x (bf16)
        + sum(int(np.prod(a.shape)) * a.dtype.itemsize for a in weight_args)
        + padded_batch * PD_OUT * 4                                # out (f32)
    )
    cost = pl.CostEstimate(flops=flops, transcendentals=0,
                           bytes_accessed=bytes_accessed)

    out = pl.pallas_call(
        _mlp_kernel,
        out_shape=jax.ShapeDtypeStruct((padded_batch, PD_OUT), jnp.float32),
        grid=grid,
        in_specs=[pl.BlockSpec((tile_b, PD_IN), lambda i: (i, 0))]
                 + [resident_spec(a) for a in weight_args],
        out_specs=pl.BlockSpec((tile_b, PD_OUT), lambda i: (i, 0)),
        compiler_params=pltpu.CompilerParams(
            dimension_semantics=("parallel",)),   # v7x: shard batch over 2 TCs
        cost_estimate=cost,
    )(x_p, *weight_args)

    return out[:batch]


def init_params(key):
    """Deterministic init mirroring Layer_06.reset_parameters():
    weight ~ U(-lim, lim) with lim = 1/sqrt(weight.size()[0]) (= out_features);
    bias = 0. Weights stored transposed (in, out), zero-padded to lane multiples,
    cast to bf16 for the MXU. Biases padded with zeros, kept f32."""
    logical = [(D_IN, D1), (D1, D2), (D2, D3), (D3, D_OUT)]
    padded = [(PD_IN, PD1), (PD1, PD2), (PD2, PD3), (PD3, PD_OUT)]
    params = {}
    keys = jax.random.split(key, len(logical))
    for i, ((din, dout), (pdin, pdout), k) in enumerate(zip(logical, padded, keys),
                                                        start=1):
        lim = 1.0 / np.sqrt(dout)  # matches fan_in = layer.weight.size()[0]
        w = jax.random.uniform(k, (din, dout), dtype=jnp.float32,
                               minval=-lim, maxval=lim)
        w_pad = jnp.zeros((pdin, pdout), jnp.float32).at[:din, :dout].set(w)
        params[f"w{i}"] = w_pad.astype(jnp.bfloat16)
        params[f"b{i}"] = jnp.zeros((1, pdout), dtype=jnp.float32)
    return params


def _ref_layer(h, w, b, act):
    acc = jnp.dot(h, w, preferred_element_type=jnp.float32) + b
    if act:
        acc = jnp.where(acc >= 0, acc, NEG_SLOPE * acc)
    return acc


def reference_forward_padded(x, params):
    """Pure-JAX reference with the exact same padded-weight bf16 recipe as the
    kernel (tight-tolerance check of the Pallas machinery itself)."""
    h = jnp.pad(x, ((0, 0), (0, PD_IN - D_IN))).astype(jnp.bfloat16)
    h = _ref_layer(h, params["w1"], params["b1"], True).astype(jnp.bfloat16)
    h = _ref_layer(h, params["w2"], params["b2"], True).astype(jnp.bfloat16)
    h = _ref_layer(h, params["w3"], params["b3"], True).astype(jnp.bfloat16)
    return _ref_layer(h, params["w4"], params["b4"], False)


def reference_forward_logical(x, params):
    """Unpadded (logical-dim) bf16 reference: verifies the zero padding never
    leaks into the logical outputs."""
    ws = [params["w1"][:D_IN, :D1], params["w2"][:D1, :D2],
          params["w3"][:D2, :D3], params["w4"][:D3, :D_OUT]]
    bs = [params["b1"][:, :D1], params["b2"][:, :D2],
          params["b3"][:, :D3], params["b4"][:, :D_OUT]]
    h = x.astype(jnp.bfloat16)
    h = _ref_layer(h, ws[0], bs[0], True).astype(jnp.bfloat16)
    h = _ref_layer(h, ws[1], bs[1], True).astype(jnp.bfloat16)
    h = _ref_layer(h, ws[2], bs[2], True).astype(jnp.bfloat16)
    return _ref_layer(h, ws[3], bs[3], False)


if __name__ == "__main__":
    key = jax.random.PRNGKey(0)
    k_x, k_p = jax.random.split(key)
    params = init_params(k_p)

    # Primary small test (single 16-row tile; batch padded 8 -> 16).
    batch = 8
    x = jax.random.normal(k_x, (batch, D_IN), dtype=jnp.float32)
    out = jax.block_until_ready(fully_connect_modul_266_forward(x, params))
    assert out.shape == (batch, D_OUT) and out.dtype == jnp.float32
    np.testing.assert_allclose(np.asarray(out),
                               np.asarray(reference_forward_padded(x, params)),
                               rtol=1e-4, atol=1e-4)
    # Padding-leak check against the unpadded logical-dim reference.
    np.testing.assert_allclose(np.asarray(out),
                               np.asarray(reference_forward_logical(x, params)),
                               rtol=2e-2, atol=2e-2)

    # Multi-tile / ragged-batch test: 40 rows with 16-row tiles -> 3 grid steps,
    # resident weights reused across steps, last tile half padded.
    batch2 = 40
    x2 = jax.random.normal(jax.random.PRNGKey(1), (batch2, D_IN),
                           dtype=jnp.float32)
    out2 = jax.block_until_ready(
        fully_connect_modul_266_forward(x2, params, tile_b=16))
    assert out2.shape == (batch2, D_OUT)
    np.testing.assert_allclose(np.asarray(out2),
                               np.asarray(reference_forward_padded(x2, params)),
                               rtol=1e-4, atol=1e-4)

    # Exercise the default even-tile-count path (2 tiles of 32 for batch=50).
    batch3 = 50
    x3 = jax.random.normal(jax.random.PRNGKey(2), (batch3, D_IN),
                           dtype=jnp.float32)
    out3 = jax.block_until_ready(fully_connect_modul_266_forward(x3, params))
    assert out3.shape == (batch3, D_OUT)
    np.testing.assert_allclose(np.asarray(out3),
                               np.asarray(reference_forward_padded(x3, params)),
                               rtol=1e-4, atol=1e-4)

    print("KERNEL_OK")
</pallas_src>

<mosaic_0001>
module attributes {stable_mosaic.version = 11 : i64} {
  func.func @_mlp_kernel(%arg0: i32, %arg1: memref<16x384xbf16, #tpu.memory_space<vmem>>, %arg2: memref<384x384xbf16, #tpu.memory_space<vmem>>, %arg3: memref<1x384xf32, #tpu.memory_space<vmem>>, %arg4: memref<384x256xbf16, #tpu.memory_space<vmem>>, %arg5: memref<1x256xf32, #tpu.memory_space<vmem>>, %arg6: memref<256x256xbf16, #tpu.memory_space<vmem>>, %arg7: memref<1x256xf32, #tpu.memory_space<vmem>>, %arg8: memref<256x128xbf16, #tpu.memory_space<vmem>>, %arg9: memref<1x128xf32, #tpu.memory_space<vmem>>, %arg10: memref<16x128xf32, #tpu.memory_space<vmem>>) attributes {dimension_semantics = [#tpu.dimension_semantics<parallel>], iteration_bounds = array<i64: 1>, scalar_prefetch = 0 : i64, scratch_operands = 0 : i64, tpu.core_type = #tpu.core_type<tc>, window_params = [{transform_indices = @transform_0, window_bounds = array<i64: 16, 384>}, {pipeline_mode = #tpu.pipeline_mode<synchronous>, transform_indices = @transform_1, window_bounds = array<i64: 384, 384>}, {pipeline_mode = #tpu.pipeline_mode<synchronous>, transform_indices = @transform_2, window_bounds = array<i64: 1, 384>}, {pipeline_mode = #tpu.pipeline_mode<synchronous>, transform_indices = @transform_3, window_bounds = array<i64: 384, 256>}, {pipeline_mode = #tpu.pipeline_mode<synchronous>, transform_indices = @transform_4, window_bounds = array<i64: 1, 256>}, {pipeline_mode = #tpu.pipeline_mode<synchronous>, transform_indices = @transform_5, window_bounds = array<i64: 256, 256>}, {pipeline_mode = #tpu.pipeline_mode<synchronous>, transform_indices = @transform_6, window_bounds = array<i64: 1, 256>}, {pipeline_mode = #tpu.pipeline_mode<synchronous>, transform_indices = @transform_7, window_bounds = array<i64: 256, 128>}, {pipeline_mode = #tpu.pipeline_mode<synchronous>, transform_indices = @transform_8, window_bounds = array<i64: 1, 128>}, {transform_indices = @transform_9, window_bounds = array<i64: 16, 128>}]} {
    %c0 = arith.constant 0 : index
    %c0_0 = arith.constant 0 : index
    %0 = vector.load %arg1[%c0, %c0_0] : memref<16x384xbf16, #tpu.memory_space<vmem>>, vector<16x384xbf16>
    %c0_1 = arith.constant 0 : index
    %c0_2 = arith.constant 0 : index
    %1 = vector.load %arg2[%c0_1, %c0_2] : memref<384x384xbf16, #tpu.memory_space<vmem>>, vector<384x384xbf16>
    %cst = arith.constant dense<0.000000e+00> : vector<16x384xf32>
    %2 = tpu.matmul %0, %1, %cst {dimension_numbers = #tpu.dot_dimension_numbers<[1], [0], [0], [1], [0, 0, 1, 1], [], []>} : vector<16x384xbf16>, vector<384x384xbf16>, vector<16x384xf32> -> vector<16x384xf32>
    %c0_3 = arith.constant 0 : index
    %c0_4 = arith.constant 0 : index
    %3 = vector.load %arg3[%c0_3, %c0_4] : memref<1x384xf32, #tpu.memory_space<vmem>>, vector<1x384xf32>
    %4 = vector.broadcast %3 : vector<1x384xf32> to vector<16x384xf32>
    %5 = arith.addf %2, %4 : vector<16x384xf32>
    %cst_5 = arith.constant 0.000000e+00 : f32
    %6 = vector.broadcast %cst_5 : f32 to vector<16x384xf32>
    %7 = arith.cmpf oge, %5, %6 : vector<16x384xf32>
    %cst_6 = arith.constant 5.000000e-02 : f32
    %8 = vector.broadcast %cst_6 : f32 to vector<16x384xf32>
    %9 = arith.mulf %8, %5 : vector<16x384xf32>
    %10 = arith.select %7, %5, %9 : vector<16x384xi1>, vector<16x384xf32>
    %11 = arith.truncf %10 : vector<16x384xf32> to vector<16x384xbf16>
    %c0_7 = arith.constant 0 : index
    %c0_8 = arith.constant 0 : index
    %12 = vector.load %arg4[%c0_7, %c0_8] : memref<384x256xbf16, #tpu.memory_space<vmem>>, vector<384x256xbf16>
    %cst_9 = arith.constant dense<0.000000e+00> : vector<16x256xf32>
    %13 = tpu.matmul %11, %12, %cst_9 {dimension_numbers = #tpu.dot_dimension_numbers<[1], [0], [0], [1], [0, 0, 1, 1], [], []>} : vector<16x384xbf16>, vector<384x256xbf16>, vector<16x256xf32> -> vector<16x256xf32>
    %c0_10 = arith.constant 0 : index
    %c0_11 = arith.constant 0 : index
    %14 = vector.load %arg5[%c0_10, %c0_11] : memref<1x256xf32, #tpu.memory_space<vmem>>, vector<1x256xf32>
    %15 = vector.broadcast %14 : vector<1x256xf32> to vector<16x256xf32>
    %16 = arith.addf %13, %15 : vector<16x256xf32>
    %cst_12 = arith.constant 0.000000e+00 : f32
    %17 = vector.broadcast %cst_12 : f32 to vector<16x256xf32>
    %18 = arith.cmpf oge, %16, %17 : vector<16x256xf32>
    %cst_13 = arith.constant 5.000000e-02 : f32
    %19 = vector.broadcast %cst_13 : f32 to vector<16x256xf32>
    %20 = arith.mulf %19, %16 : vector<16x256xf32>
    %21 = arith.select %18, %16, %20 : vector<16x256xi1>, vector<16x256xf32>
    %22 = arith.truncf %21 : vector<16x256xf32> to vector<16x256xbf16>
    %c0_14 = arith.constant 0 : index
    %c0_15 = arith.constant 0 : index
    %23 = vector.load %arg6[%c0_14, %c0_15] : memref<256x256xbf16, #tpu.memory_space<vmem>>, vector<256x256xbf16>
    %cst_16 = arith.constant dense<0.000000e+00> : vector<16x256xf32>
    %24 = tpu.matmul %22, %23, %cst_16 {dimension_numbers = #tpu.dot_dimension_numbers<[1], [0], [0], [1], [0, 0, 1, 1], [], []>} : vector<16x256xbf16>, vector<256x256xbf16>, vector<16x256xf32> -> vector<16x256xf32>
    %c0_17 = arith.constant 0 : index
    %c0_18 = arith.constant 0 : index
    %25 = vector.load %arg7[%c0_17, %c0_18] : memref<1x256xf32, #tpu.memory_space<vmem>>, vector<1x256xf32>
    %26 = vector.broadcast %25 : vector<1x256xf32> to vector<16x256xf32>
    %27 = arith.addf %24, %26 : vector<16x256xf32>
    %cst_19 = arith.constant 0.000000e+00 : f32
    %28 = vector.broadcast %cst_19 : f32 to vector<16x256xf32>
    %29 = arith.cmpf oge, %27, %28 : vector<16x256xf32>
    %cst_20 = arith.constant 5.000000e-02 : f32
    %30 = vector.broadcast %cst_20 : f32 to vector<16x256xf32>
    %31 = arith.mulf %30, %27 : vector<16x256xf32>
    %32 = arith.select %29, %27, %31 : vector<16x256xi1>, vector<16x256xf32>
    %33 = arith.truncf %32 : vector<16x256xf32> to vector<16x256xbf16>
    %c0_21 = arith.constant 0 : index
    %c0_22 = arith.constant 0 : index
    %34 = vector.load %arg8[%c0_21, %c0_22] : memref<256x128xbf16, #tpu.memory_space<vmem>>, vector<256x128xbf16>
    %cst_23 = arith.constant dense<0.000000e+00> : vector<16x128xf32>
    %35 = tpu.matmul %33, %34, %cst_23 {dimension_numbers = #tpu.dot_dimension_numbers<[1], [0], [0], [1], [0, 0, 1, 1], [], []>} : vector<16x256xbf16>, vector<256x128xbf16>, vector<16x128xf32> -> vector<16x128xf32>
    %c0_24 = arith.constant 0 : index
    %c0_25 = arith.constant 0 : index
    %36 = vector.load %arg9[%c0_24, %c0_25] : memref<1x128xf32, #tpu.memory_space<vmem>>, vector<1x128xf32>
    %37 = vector.broadcast %36 : vector<1x128xf32> to vector<16x128xf32>
    %38 = arith.addf %35, %37 : vector<16x128xf32>
    %c0_26 = arith.constant 0 : index
    %c0_27 = arith.constant 0 : index
    %39 = vector.load %arg10[%c0_26, %c0_27] : memref<16x128xf32, #tpu.memory_space<vmem>>, vector<16x128xf32>
    tpu.vector_store %arg10[%c0_26, %c0_27], %38 {strides = array<i32>} : memref<16x128xf32, #tpu.memory_space<vmem>>, vector<16x128xf32>,
    return
  }
  func.func @transform_0(%arg0: i32) -> (i32, i32) {
    %c0_i32 = arith.constant 0 : i32
    %c0_i32_0 = arith.constant 0 : i32
    return %arg0, %c0_i32 : i32, i32
  }
  func.func @transform_1(%arg0: i32) -> (i32, i32) {
    %c0_i32 = arith.constant 0 : i32
    %c0_i32_0 = arith.constant 0 : i32
    %c0_i32_1 = arith.constant 0 : i32
    return %c0_i32, %c0_i32_0 : i32, i32
  }
  func.func @transform_2(%arg0: i32) -> (i32, i32) {
    %c0_i32 = arith.constant 0 : i32
    %c0_i32_0 = arith.constant 0 : i32
    %c0_i32_1 = arith.constant 0 : i32
    return %c0_i32, %c0_i32_0 : i32, i32
  }
  func.func @transform_3(%arg0: i32) -> (i32, i32) {
    %c0_i32 = arith.constant 0 : i32
    %c0_i32_0 = arith.constant 0 : i32
    %c0_i32_1 = arith.constant 0 : i32
    return %c0_i32, %c0_i32_0 : i32, i32
  }
  func.func @transform_4(%arg0: i32) -> (i32, i32) {
    %c0_i32 = arith.constant 0 : i32
    %c0_i32_0 = arith.constant 0 : i32
    %c0_i32_1 = arith.constant 0 : i32
    return %c0_i32, %c0_i32_0 : i32, i32
  }
  func.func @transform_5(%arg0: i32) -> (i32, i32) {
    %c0_i32 = arith.constant 0 : i32
    %c0_i32_0 = arith.constant 0 : i32
    %c0_i32_1 = arith.constant 0 : i32
    return %c0_i32, %c0_i32_0 : i32, i32
  }
  func.func @transform_6(%arg0: i32) -> (i32, i32) {
    %c0_i32 = arith.constant 0 : i32
    %c0_i32_0 = arith.constant 0 : i32
    %c0_i32_1 = arith.constant 0 : i32
    return %c0_i32, %c0_i32_0 : i32, i32
  }
  func.func @transform_7(%arg0: i32) -> (i32, i32) {
    %c0_i32 = arith.constant 0 : i32
    %c0_i32_0 = arith.constant 0 : i32
    %c0_i32_1 = arith.constant 0 : i32
    return %c0_i32, %c0_i32_0 : i32, i32
  }
  func.func @transform_8(%arg0: i32) -> (i32, i32) {
    %c0_i32 = arith.constant 0 : i32
    %c0_i32_0 = arith.constant 0 : i32
    %c0_i32_1 = arith.constant 0 : i32
    return %c0_i32, %c0_i32_0 : i32, i32
  }
  func.func @transform_9(%arg0: i32) -> (i32, i32) {
    %c0_i32 = arith.constant 0 : i32
    %c0_i32_0 = arith.constant 0 : i32
    return %arg0, %c0_i32 : i32, i32
  }
}

</mosaic_0001>

<bundles_post_ra>
// kernel: tpu_custom_call.1
= control target key start
LH: loop header
LB: loop body
LE: loop exit
PB: predicated region body
PF: predicated region fallthrough
CT: control target
= control target key end

     0   :  { %14 = vsyncpa [#allocation3], 0  ;;  %s2497_s0 = inlined_call_operand.hbm [shape: bf16[16,384], index: 0, kind: input, shape index: {}]   ;;  %s2498_s1 = inlined_call_operand.hbm [shape: bf16[384,384], index: 1, kind: input, shape index: {}]   ;;  %s2499_s2 = inlined_call_operand.vmem [shape: f32[1,384], index: 2, kind: input, shape index: {}]   ;;  %s2500_s3 = inlined_call_operand.hbm [shape: bf16[384,256], index: 3, kind: input, shape index: {}]   ;;  %s2501_s4 = inlined_call_operand.vmem [shape: f32[1,256], index: 4, kind: input, shape index: {}]   ;;  %s2502_s5 = inlined_call_operand.hbm [shape: bf16[256,256], index: 5, kind: input, shape index: {}]   ;;  %s2503_s6 = inlined_call_operand.vmem [shape: f32[1,256], index: 6, kind: input, shape index: {}]   ;;  %s2504_s7 = inlined_call_operand.hbm [shape: bf16[256,128], index: 7, kind: input, shape index: {}]   ;;  %s2505_s8 = inlined_call_operand.vmem [shape: f32[1,128], index: 8, kind: input, shape index: {}]   ;;  %s2506_s9 = inlined_call_operand.hbm [shape: f32[16,128], index: 9, kind: output, shape index: {}]  }
   0x1   :  { %15 = vsyncpa [#allocation6], 0 }
   0x2   :  { %16 = vsyncpa [#allocation9], 0 }
   0x3   :  { %17 = vsyncpa [#allocation4], 0  ;;  %s2318_s30 = smov [#allocation5]   ;;  %s2178_s13 = scalar_lea.hbm %s2498_s1, 9216 }
   0x4   :  { %s35_s10 = sshll.u32 %s2318_s30, 4  ;;  %p2179_p0 = scmp.ne.s32.totalorder %s2498_s1, %s2178_s13  ;;  %s36_s10 = int_to_ptr.vmem [resolvable:$true] %s35_s10 }
   0x5   :  { %p2182_p1 = scmp.lt.u32.totalorder %s2178_s13, %s2498_s1 }
   0x7   :  { %p2184_p2 = pnand %p2182_p1, %p2179_p0 }
   0x9   :  { %2187 = shalt.err (!%p2184_p2)
}
   0xa   :  { %s2188_s18 = scalar_lea.vmem %s36_s10, 9216  ;;  %p2193_p4 = scmp.lt.s32.totalorder %s36_s10, %s36_s10 }
   0xb   :  { %p2189_p3 = scmp.ne.s32.totalorder %s36_s10, %s2188_s18  ;;  %p2194_p5 = scmp.lt.s32.totalorder %s2188_s18, %s2188_s18 }
   0xd   :  { %p2195_p6 = por %p2194_p5, %p2193_p4 }
   0xf   :  { %p2196_p7 = pnand %p2195_p6, %p2189_p3 }
  0x11   :  { %2199 = shalt.err (!%p2196_p7)
}
  0x12   :  { %s2319_s19 = smov 192   ;;  %s2320_s20 = smov 12  }
  0x13   :  { %41 = dma.hbm_to_vmem [thread:$0]  %s2498_s1, 9216, %s36_s10, [#allocation6], %s2319_s19, %s2319_s19, %s2320_s20  }
  0x14   :  { %s2321_s23 = smov [#allocation8]   ;;  %s2322_s25 = smov [#allocation2]  }
  0x15   :  { %s63_s24 = sshll.u32 %s2321_s23, 4  ;;  %s23_s26 = sshll.u32 %s2322_s25, 4  ;;  %s64_s24 = int_to_ptr.vmem [resolvable:$true] %s63_s24  ;;  %s24_s26 = int_to_ptr.vmem [resolvable:$true] %s23_s26 }
  0x16   :  { %s2200_s29 = scalar_lea.hbm %s2502_s5, 4096 }
  0x17   :  { %p2201_p8 = scmp.ne.s32.totalorder %s2502_s5, %s2200_s29  ;;  %p2204_p9 = scmp.lt.u32.totalorder %s2200_s29, %s2502_s5 }
  0x19   :  { %p2206_p10 = pnand %p2204_p9, %p2201_p8 }
  0x1b   :  { %2209 = shalt.err (!%p2206_p10)
}
  0x1c   :  { %s2210_s1 = scalar_lea.vmem %s64_s24, 4096  ;;  %p2215_p12 = scmp.lt.s32.totalorder %s64_s24, %s64_s24 }
  0x1d   :  { %p2211_p11 = scmp.ne.s32.totalorder %s64_s24, %s2210_s1  ;;  %p2216_p13 = scmp.lt.s32.totalorder %s2210_s1, %s2210_s1 }
  0x1f   :  { %p2217_p0 = por %p2216_p13, %p2215_p12 }
  0x21   :  { %p2218_p1 = pnand %p2217_p0, %p2211_p11 }
  0x23   :  { %2221 = shalt.err (!%p2218_p1)
}
  0x24   :  { %s2323_s10 = smov 128   ;;  %s2324_s14 = smov 8  }
  0x25   :  { %69 = dma.hbm_to_vmem [thread:$0]  %s2502_s5, 4096, %s64_s24, [#allocation9], %s2323_s10, %s2323_s10, %s2324_s14  }
  0x26   :  { %s2222_s21 = scalar_lea.hbm %s2497_s0, 384 }
  0x27   :  { %p2223_p2 = scmp.ne.s32.totalorder %s2497_s0, %s2222_s21  ;;  %p2226_p3 = scmp.lt.u32.totalorder %s2222_s21, %s2497_s0 }
  0x29   :  { %p2228_p4 = pnand %p2226_p3, %p2223_p2 }
  0x2b   :  { %2231 = shalt.err (!%p2228_p4)
}
  0x2c   :  { %s2232_s28 = scalar_lea.vmem %s24_s26, 384  ;;  %p2237_p6 = scmp.lt.s32.totalorder %s24_s26, %s24_s26 }
  0x2d   :  { %p2233_p5 = scmp.ne.s32.totalorder %s24_s26, %s2232_s28  ;;  %p2238_p7 = scmp.lt.s32.totalorder %s2232_s28, %s2232_s28 }
  0x2f   :  { %p2239_p8 = por %p2238_p7, %p2237_p6 }
  0x31   :  { %p2240_p9 = pnand %p2239_p8, %p2233_p5 }
  0x33   :  { %2243 = shalt.err (!%p2240_p9)
}
  0x34   :  { %29 = dma.hbm_to_vmem [thread:$0]  %s2497_s0, 384, %s24_s26, [#allocation3], %s2319_s19, %s2319_s19, %s2320_s20  }
  0x35   :  { %s2325_s29 = smov [#allocation7]   ;;  %s2326_s11 = smov [#allocation10]  }
  0x36   :  { %s49_s30 = sshll.u32 %s2325_s29, 4  ;;  %s77_s12 = sshll.u32 %s2326_s11, 4  ;;  %s50_s30 = int_to_ptr.vmem [resolvable:$true] %s49_s30  ;;  %s78_s12 = int_to_ptr.vmem [resolvable:$true] %s77_s12 }
  0x37   :  { %s2244_s15 = scalar_lea.hbm %s2500_s3, 6144 }
  0x38   :  { %p2245_p10 = scmp.ne.s32.totalorder %s2500_s3, %s2244_s15  ;;  %p2248_p11 = scmp.lt.u32.totalorder %s2244_s15, %s2500_s3 }
  0x3a   :  { %p2250_p12 = pnand %p2248_p11, %p2245_p10 }
  0x3c   :  { %2253 = shalt.err (!%p2250_p12)
}
  0x3d   :  { %s2254_s0 = scalar_lea.vmem %s50_s30, 6144  ;;  %p2259_p0 = scmp.lt.s32.totalorder %s50_s30, %s50_s30 }
  0x3e   :  { %p2255_p13 = scmp.ne.s32.totalorder %s50_s30, %s2254_s0  ;;  %p2260_p1 = scmp.lt.s32.totalorder %s2254_s0, %s2254_s0 }
  0x40   :  { %p2261_p2 = por %p2260_p1, %p2259_p0 }
  0x42   :  { %p2262_p3 = pnand %p2261_p2, %p2255_p13 }
  0x44   :  { %2265 = shalt.err (!%p2262_p3)
}
  0x45   :  { %55 = dma.hbm_to_vmem [thread:$0]  %s2500_s3, 6144, %s50_s30, [#allocation6], %s2323_s10, %s2323_s10, %s2324_s14  }
  0x46   :  { %s2266_s23 = scalar_lea.hbm %s2504_s7, 2048 }
  0x47   :  { %p2267_p4 = scmp.ne.s32.totalorder %s2504_s7, %s2266_s23  ;;  %p2270_p5 = scmp.lt.u32.totalorder %s2266_s23, %s2504_s7 }
  0x49   :  { %p2272_p6 = pnand %p2270_p5, %p2267_p4 }
  0x4b   :  { %2275 = shalt.err (!%p2272_p6)
}
  0x4c   :  { %s2276_s24 = scalar_lea.vmem %s78_s12, 2048  ;;  %p2281_p8 = scmp.lt.s32.totalorder %s78_s12, %s78_s12 }
  0x4d   :  { %p2277_p7 = scmp.ne.s32.totalorder %s78_s12, %s2276_s24  ;;  %p2282_p9 = scmp.lt.s32.totalorder %s2276_s24, %s2276_s24 }
  0x4f   :  { %p2283_p10 = por %p2282_p9, %p2281_p8 }
  0x51   :  { %p2284_p11 = pnand %p2283_p10, %p2277_p7 }
  0x53   :  { %2287 = shalt.err (!%p2284_p11)
}
  0x54   :  { %s2327_s3 = smov 64   ;;  %s2328_s29 = smov 4  }
  0x55   :  { %83 = dma.hbm_to_vmem [thread:$0]  %s2504_s7, 2048, %s78_s12, [#allocation9], %s2327_s3, %s2327_s3, %s2328_s29  }
  0x56   :  { %2310 = dma.done.wait [#allocation3], 384  }
  0x57   :  { %2311 = vsyncadd [#allocation3], 4294966912 }
  0x58   :  { %2312 = dma.done.wait [#allocation6], 15360  }
  0x59   :  { %2313 = vsyncadd [#allocation6], 4294951936 }
  0x5a   :  { %2314 = dma.done.wait [#allocation9], 6144  }
  0x5b   :  { %2315 = vsyncadd [#allocation9], 4294961152  ;;  %v1942_v0 = vld [vmem:[#allocation5 + $0x4] ss:$12 sps:$4 sm:$0xff]   ;;  %v1944_v1 = vld [vmem:[#allocation5] ss:$12 sps:$4 sm:$0xff]  }
  0x5c   :  { %619 = vmatprep.subr.bf16.mxu0 %v1942_v0  ;;  %v1945_v2 = vld [vmem:[#allocation5 + $0x1c] ss:$12 sps:$4 sm:$0xff]   ;;  %v1947_v3 = vld [vmem:[#allocation5 + $0x18] ss:$12 sps:$4 sm:$0xff]   ;;  %v1948_v4 = vld [vmem:[#allocation5 + $0x34] ss:$12 sps:$4 sm:$0xff]  }
  0x5d   :  { %620 = vmatpush1.bf16.msra.mxu0 %v1944_v1  ;;  %v1950_v5 = vld [vmem:[#allocation5 + $0x30] ss:$12 sps:$4 sm:$0xff]   ;;  %v1951_v6 = vld [vmem:[#allocation5 + $0x4c] ss:$12 sps:$4 sm:$0xff]   ;;  %v1953_v7 = vld [vmem:[#allocation5 + $0x48] ss:$12 sps:$4 sm:$0xff]  }
  0x5e   :  { %621 = vmatprep.subr.bf16.mxu0 %v1945_v2  ;;  %v1954_v8 = vld [vmem:[#allocation5 + $0x64] ss:$12 sps:$4 sm:$0xff]   ;;  %v1969_v9 = vld [vmem:[#allocation5 + $0xc8] ss:$12 sps:$4 sm:$0xff]   ;;  %v1956_v11 = vld [vmem:[#allocation5 + $0x60] ss:$12 sps:$4 sm:$0xff]  }
  0x5f   :  { %v1970_v10 = vld [vmem:[#allocation5 + $0x8] ss:$12 sps:$4 sm:$0xff]   ;;  %1838 = vmatprep.subr.bf16.mxu1 %v1969_v9  ;;  %v1974_v13 = vld [vmem:[#allocation5 + $0xe0] ss:$12 sps:$4 sm:$0xff]   ;;  %v1959_v15 = vld [vmem:[#allocation5 + $0x78] ss:$12 sps:$4 sm:$0xff]  }
  0x60   :  { %v1957_v12 = vld [vmem:[#allocation5 + $0x7c] ss:$12 sps:$4 sm:$0xff]   ;;  %1839 = vmatpush3.bf16.msra.mxu1 %v1970_v10  ;;  %v1975_v14 = vld [vmem:[#allocation5 + $0x20] ss:$12 sps:$4 sm:$0xff]   ;;  %v1979_v17 = vld [vmem:[#allocation5 + $0xf8] ss:$12 sps:$4 sm:$0xff]  }
  0x61   :  { %622 = vmatpush1.bf16.msra.mxu0 %v1947_v3  ;;  %v1960_v16 = vld [vmem:[#allocation5 + $0x94] ss:$12 sps:$4 sm:$0xff]   ;;  %1840 = vmatprep.subr.bf16.mxu1 %v1974_v13  ;;  %v1980_v18 = vld [vmem:[#allocation5 + $0x38] ss:$12 sps:$4 sm:$0xff]   ;;  %v1962_v19 = vld [vmem:[#allocation5 + $0x90] ss:$12 sps:$4 sm:$0xff]  }
  0x62   :  { %623 = vmatprep.subr.bf16.mxu0 %v1948_v4  ;;  %v1984_v20 = vld [vmem:[#allocation5 + $0x110] ss:$12 sps:$4 sm:$0xff]   ;;  %v1963_v22 = vld [vmem:[#allocation5 + $0xac] ss:$12 sps:$4 sm:$0xff]   ;;  %v1965_v23 = vld [vmem:[#allocation5 + $0xa8] ss:$12 sps:$4 sm:$0xff]  }
  0x63   :  { %v1985_v21 = vld [vmem:[#allocation5 + $0x50] ss:$12 sps:$4 sm:$0xff]   ;;  %v1989_v24 = vld [vmem:[#allocation5 + $0x128] ss:$12 sps:$4 sm:$0xff]   ;;  %v1994_v27 = vld [vmem:[#allocation5 + $0x140] ss:$12 sps:$4 sm:$0xff]  }
  0x64   :  { %1841 = vmatpush3.bf16.msra.mxu1 %v1975_v14  ;;  %v1990_v25 = vld [vmem:[#allocation5 + $0x68] ss:$12 sps:$4 sm:$0xff]   ;;  %v1966_v26 = vld [vmem:[#allocation5 + $0xc4] ss:$12 sps:$4 sm:$0xff]   ;;  %v1968_v28 = vld [vmem:[#allocation5 + $0xc0] ss:$12 sps:$4 sm:$0xff]  }
  0x65   :  { %624 = vmatpush1.bf16.msra.mxu0 %v1950_v5  ;;  %1842 = vmatprep.subr.bf16.mxu1 %v1979_v17  ;;  %v1971_v29 = vld [vmem:[#allocation5 + $0xdc] ss:$12 sps:$4 sm:$0xff]   ;;  %v1995_v30 = vld [vmem:[#allocation5 + $0x80] ss:$12 sps:$4 sm:$0xff]   ;;  %v1999_v31 = vld [vmem:[#allocation5 + $0x158] ss:$12 sps:$4 sm:$0xff]  }
  0x66   :  { %625 = vmatprep.subr.bf16.mxu0 %v1951_v6  ;;  %v1973_v32 = vld [vmem:[#allocation5 + $0xd8] ss:$12 sps:$4 sm:$0xff]   ;;  %v1976_v33 = vld [vmem:[#allocation5 + $0xf4] ss:$12 sps:$4 sm:$0xff]   ;;  %v2004_v35 = vld [vmem:[#allocation5 + $0x170] ss:$12 sps:$4 sm:$0xff]  }
  0x67   :  { %v2000_v34 = vld [vmem:[#allocation5 + $0x98] ss:$12 sps:$4 sm:$0xff]   ;;  %v1978_v37 = vld [vmem:[#allocation5 + $0xf0] ss:$12 sps:$4 sm:$0xff]   ;;  %v1983_v40 = vld [vmem:[#allocation5 + $0x108] ss:$12 sps:$4 sm:$0xff]  }
  0x68   :  { %1843 = vmatpush3.bf16.msra.mxu1 %v1980_v18  ;;  %v2008_v36 = vld [vmem:[#allocation2 + $0x4] ss:$12 sps:$4 sm:$0xff]   ;;  %v2005_v38 = vld [vmem:[#allocation5 + $0xb0] ss:$12 sps:$4 sm:$0xff]   ;;  %v2012_v41 = vld [vmem:[#allocation5 + $0x188] ss:$12 sps:$4 sm:$0xff]  }
  0x69   :  { %626 = vmatpush1.bf16.msra.mxu0 %v1953_v7  ;;  %1844 = vmatprep.subr.bf16.mxu1 %v1984_v20  ;;  %v1981_v39 = vld [vmem:[#allocation5 + $0x10c] ss:$12 sps:$4 sm:$0xff]   ;;  %v1986_v42 = vld [vmem:[#allocation5 + $0x124] ss:$12 sps:$4 sm:$0xff]   ;;  %v2006_v43 = vld [vmem:[#allocation2] ss:$12 sps:$4 sm:$0xff]  }
  0x6a   :  { %627 = vmatprep.subr.bf16.mxu0 %v1954_v8  ;;  %651 = vmatprep.mubr.bf16.mxu0 %v2008_v36  ;;  %v2329_v44 = vmov 0.0   ;;  %v1988_v45 = vld [vmem:[#allocation5 + $0x120] ss:$12 sps:$4 sm:$0xff]   ;;  %v1991_v47 = vld [vmem:[#allocation5 + $0x13c] ss:$12 sps:$4 sm:$0xff]   ;;  %vm2330_vm0 = vmmov 0  }
  0x6b   :  { %737 = vmatprep.mubr.bf16.mxu1 %v2008_v36  ;;  %v2016_v46 = vld [vmem:[#allocation5 + $0x1a0] ss:$12 sps:$4 sm:$0xff]   ;;  %v1993_v48 = vld [vmem:[#allocation5 + $0x138] ss:$12 sps:$4 sm:$0xff]   ;;  %v1998_v51 = vld [vmem:[#allocation5 + $0x150] ss:$12 sps:$4 sm:$0xff]  }
  0x6c   :  { %1845 = vmatpush3.bf16.msra.mxu1 %v1985_v21  ;;  %v2020_v49 = vld [vmem:[#allocation5 + $0x1b8] ss:$12 sps:$4 sm:$0xff]   ;;  %v1996_v50 = vld [vmem:[#allocation5 + $0x154] ss:$12 sps:$4 sm:$0xff]   ;;  %v2024_v52 = vld [vmem:[#allocation5 + $0x1d0] ss:$12 sps:$4 sm:$0xff]  }
  0x6d   :  { %628 = vmatpush1.bf16.msra.mxu0 %v1956_v11  ;;  %1846 = vmatprep.subr.bf16.mxu1 %v1989_v24  ;;  %v2001_v53 = vld [vmem:[#allocation5 + $0x16c] ss:$12 sps:$4 sm:$0xff]   ;;  %v2003_v54 = vld [vmem:[#allocation5 + $0x168] ss:$12 sps:$4 sm:$0xff]   ;;  %v2011_v56 = vld [vmem:[#allocation5 + $0x184] ss:$12 sps:$4 sm:$0xff]  }
  0x6e   :  { %629 = vmatprep.subr.bf16.mxu0 %v1957_v12  ;;  %v2028_v55 = vld [vmem:[#allocation5 + $0x1e8] ss:$12 sps:$4 sm:$0xff]   ;;  %v2009_v57 = vld [vmem:[#allocation5 + $0x180] ss:$12 sps:$4 sm:$0xff]   ;;  %v2013_v60 = vld [vmem:[#allocation5 + $0x198] ss:$12 sps:$4 sm:$0xff]  }
  0x6f   :  { %v2032_v58 = vld [vmem:[#allocation5 + $0x200] ss:$12 sps:$4 sm:$0xff]   ;;  %v2015_v59 = vld [vmem:[#allocation5 + $0x19c] ss:$12 sps:$4 sm:$0xff]   ;;  %v2036_v61 = vld [vmem:[#allocation5 + $0x218] ss:$12 sps:$4 sm:$0xff]  }
  0x70   :  { %1847 = vmatpush3.bf16.msra.mxu1 %v1990_v25  ;;  %v2019_v62 = vld [vmem:[#allocation5 + $0x1b4] ss:$12 sps:$4 sm:$0xff]   ;;  %v2331_v63 = vmov 0   ;;  %v2017_v0 = vld [vmem:[#allocation5 + $0x1b0] ss:$12 sps:$4 sm:$0xff]   ;;  %s2332_s16 = smov [#allocation11]  }
  0x71   :  { %630 = vmatpush1.bf16.msra.mxu0 %v1959_v15  ;;  %1848 = vmatprep.subr.bf16.mxu1 %v1994_v27  ;;  %v2040_v1 = vld [vmem:[#allocation5 + $0x230] ss:$12 sps:$4 sm:$0xff]   ;;  %v2023_v2 = vld [vmem:[#allocation5 + $0x1cc] ss:$12 sps:$4 sm:$0xff]   ;;  %v2021_v4 = vld [vmem:[#allocation5 + $0x1c8] ss:$12 sps:$4 sm:$0xff]  }
  0x72   :  { %631 = vmatprep.subr.bf16.mxu0 %v1960_v16  ;;  %v2044_v3 = vld [vmem:[#allocation7 + $0x4] ss:$8 sps:$4 sm:$0xff]   ;;  %v2041_v6 = vld [vmem:[#allocation2 + $0x8] ss:$12 sps:$4 sm:$0xff]   ;;  %v2042_v7 = vld [vmem:[#allocation7] ss:$8 sps:$4 sm:$0xff]  }
  0x73   :  { %v2027_v5 = vld [vmem:[#allocation5 + $0x1e4] ss:$12 sps:$4 sm:$0xff]   ;;  %v2047_v8 = vld [vmem:[#allocation7 + $0x14] ss:$8 sps:$4 sm:$0xff]   ;;  %v2025_v9 = vld [vmem:[#allocation5 + $0x1e0] ss:$12 sps:$4 sm:$0xff]  }
  0x74   :  { %1849 = vmatpush3.bf16.msra.mxu1 %v1995_v30  ;;  %v2045_v10 = vld [vmem:[#allocation7 + $0x10] ss:$8 sps:$4 sm:$0xff]   ;;  %v2031_v11 = vld [vmem:[#allocation5 + $0x1fc] ss:$12 sps:$4 sm:$0xff]   ;;  %v2050_v12 = vld [vmem:[#allocation7 + $0x24] ss:$8 sps:$4 sm:$0xff]  }
  0x75   :  { %632 = vmatpush1.bf16.msra.mxu0 %v1962_v19  ;;  %1850 = vmatprep.subr.bf16.mxu1 %v1999_v31  ;;  %v2029_v13 = vld [vmem:[#allocation5 + $0x1f8] ss:$12 sps:$4 sm:$0xff]   ;;  %v2048_v14 = vld [vmem:[#allocation7 + $0x20] ss:$8 sps:$4 sm:$0xff]   ;;  %v2053_v16 = vld [vmem:[#allocation7 + $0x34] ss:$8 sps:$4 sm:$0xff]  }
  0x76   :  { %633 = vmatprep.subr.bf16.mxu0 %v1963_v22  ;;  %v2035_v15 = vld [vmem:[#allocation5 + $0x214] ss:$12 sps:$4 sm:$0xff]   ;;  %v2033_v17 = vld [vmem:[#allocation5 + $0x210] ss:$12 sps:$4 sm:$0xff]   ;;  %v2039_v19 = vld [vmem:[#allocation5 + $0x22c] ss:$12 sps:$4 sm:$0xff]  }
  0x77   :  { %v2051_v18 = vld [vmem:[#allocation7 + $0x30] ss:$8 sps:$4 sm:$0xff]   ;;  %v2056_v20 = vld [vmem:[#allocation7 + $0x44] ss:$8 sps:$4 sm:$0xff]   ;;  %v2037_v21 = vld [vmem:[#allocation5 + $0x228] ss:$12 sps:$4 sm:$0xff]  }
  0x78   :  { %1851 = vmatpush3.bf16.msra.mxu1 %v2000_v34  ;;  %v2054_v22 = vld [vmem:[#allocation7 + $0x40] ss:$8 sps:$4 sm:$0xff]   ;;  %v2057_v24 = vld [vmem:[#allocation7 + $0x50] ss:$8 sps:$4 sm:$0xff]   ;;  %v2062_v25 = vld [vmem:[#allocation7 + $0x64] ss:$8 sps:$4 sm:$0xff]  }
  0x79   :  { %634 = vmatpush1.bf16.msra.mxu0 %v1965_v23  ;;  %1852 = vmatprep.subr.bf16.mxu1 %v2004_v35  ;;  %v2059_v23 = vld [vmem:[#allocation7 + $0x54] ss:$8 sps:$4 sm:$0xff]   ;;  %v2066_v30 = vld [vmem:[#allocation7 + $0x80] ss:$8 sps:$4 sm:$0xff]   ;;  %v2075_v36 = vld [vmem:[#allocation7 + $0xb0] ss:$8 sps:$4 sm:$0xff]  }
  0x7a   :  { %635 = vmatprep.subr.bf16.mxu0 %v1966_v26  ;;  %v2060_v26 = vld [vmem:[#allocation7 + $0x60] ss:$8 sps:$4 sm:$0xff]   ;;  %v2065_v27 = vld [vmem:[#allocation7 + $0x74] ss:$8 sps:$4 sm:$0xff]   ;;  %s1652_s17 = sshll.u32 %s2332_s16, 4  ;;  %s1653_s17 = int_to_ptr.vmem [resolvable:$true] %s1652_s17 }
  0x7b   :  { %v2071_v31 = vld [vmem:[#allocation7 + $0x94] ss:$8 sps:$4 sm:$0xff]   ;;  %v2072_v34 = vld [vmem:[#allocation7 + $0xa0] ss:$8 sps:$4 sm:$0xff]   ;;  %s2288_s18 = scalar_lea.vmem %s1653_s17, 256  ;;  %p2293_p13 = scmp.lt.s32.totalorder %s1653_s17, %s1653_s17 }
  0x7c   :  { %1853 = vmatpush3.bf16.msra.mxu1 %v2005_v38  ;;  %v2077_v35 = vld [vmem:[#allocation7 + $0xb4] ss:$8 sps:$4 sm:$0xff]   ;;  %v2078_v38 = vld [vmem:[#allocation7 + $0xc0] ss:$8 sps:$4 sm:$0xff]   ;;  %p2289_p12 = scmp.ne.s32.totalorder %s1653_s17, %s2288_s18  ;;  %p2294_p0 = scmp.lt.s32.totalorder %s2288_s18, %s2288_s18 }
  0x7d   :  { %636 = vmatpush1.bf16.msra.mxu0 %v1968_v28  ;;  %1891 = vmatprep.subr.bf16.mxu1 %v2329_v44  ;;  %v2063_v28 = vld [vmem:[#allocation7 + $0x70] ss:$8 sps:$4 sm:$0xff]  }
  0x7e   :  { %637 = vmatprep.subr.bf16.mxu0 %v1971_v29  ;;  %v2068_v29 = vld [vmem:[#allocation7 + $0x84] ss:$8 sps:$4 sm:$0xff]   ;;  %p2295_p1 = por %p2294_p0, %p2293_p13 }
  0x7f   :  { %738 = vmatmul.mubr.bf16.vlgmr.msra.gmra.mrb[0].mxu1 %v2006_v43 }
  0x80   :  { %1892 = vmatpush3.bf16.msra.mxu1 %v2012_v41  ;;  %1907 = vmatprep.mubr.msk.bf16.mxu1 %vm2330_vm0, %v2329_v44  ;;  %v2086_v41 = vld [vmem:[#allocation7 + $0xe4] ss:$8 sps:$4 sm:$0xff]   ;;  %p2296_p2 = pnand %p2295_p1, %p2289_p12 }
  0x81   :  { %638 = vmatpush1.bf16.msra.mxu0 %v1973_v32  ;;  %1893 = vmatprep.subr.bf16.mxu1 %v2329_v44  ;;  %v2069_v32 = vld [vmem:[#allocation7 + $0x90] ss:$8 sps:$4 sm:$0xff]  }
  0x82   :  { %639 = vmatprep.subr.bf16.mxu0 %v1976_v33  ;;  %v2074_v33 = vld [vmem:[#allocation7 + $0xa4] ss:$8 sps:$4 sm:$0xff]  }
  0x84   :  { %1894 = vmatpush3.bf16.msra.mxu1 %v2016_v46  ;;  %v2114_v46 = vld [vmem:[#allocation8] ss:$8 sps:$4 sm:$0xff]  }
  0x85   :  { %640 = vmatpush1.bf16.msra.mxu0 %v1978_v37  ;;  %1895 = vmatprep.subr.bf16.mxu1 %v2329_v44  ;;  %v2080_v37 = vld [vmem:[#allocation7 + $0xc4] ss:$8 sps:$4 sm:$0xff]  }
  0x86   :  { %641 = vmatprep.subr.bf16.mxu0 %v1981_v39  ;;  %v2081_v39 = vld [vmem:[#allocation7 + $0xd0] ss:$8 sps:$4 sm:$0xff]  }
  0x88   :  { %1896 = vmatpush3.bf16.msra.mxu1 %v2020_v49  ;;  %v2117_v49 = vld [vmem:[#allocation8 + $0x10] ss:$8 sps:$4 sm:$0xff]  }
  0x89   :  { %642 = vmatpush1.bf16.msra.mxu0 %v1983_v40  ;;  %1897 = vmatprep.subr.bf16.mxu1 %v2329_v44  ;;  %v2083_v40 = vld [vmem:[#allocation7 + $0xd4] ss:$8 sps:$4 sm:$0xff]  }
  0x8a   :  { %643 = vmatprep.subr.bf16.mxu0 %v1986_v42  ;;  %v2084_v42 = vld [vmem:[#allocation7 + $0xe0] ss:$8 sps:$4 sm:$0xff]  }
  0x8c   :  { %1898 = vmatpush3.bf16.msra.mxu1 %v2024_v52  ;;  %v2125_v52 = vld [vmem:[#allocation8 + $0x34] ss:$8 sps:$4 sm:$0xff]  }
  0x8d   :  { %644 = vmatpush1.bf16.msra.mxu0 %v1988_v45  ;;  %1899 = vmatprep.subr.bf16.mxu1 %v2329_v44  ;;  %v2092_v45 = vld [vmem:[#allocation7 + $0x104] ss:$8 sps:$4 sm:$0xff]  }
  0x8e   :  { %645 = vmatprep.subr.bf16.mxu0 %v1991_v47  ;;  %v2116_v47 = vld [vmem:[#allocation8 + $0x4] ss:$8 sps:$4 sm:$0xff]  }
  0x90   :  { %1900 = vmatpush3.bf16.msra.mxu1 %v2028_v55  ;;  %v2126_v55 = vld [vmem:[#allocation8 + $0x40] ss:$8 sps:$4 sm:$0xff]  }
  0x91   :  { %646 = vmatpush1.bf16.msra.mxu0 %v1993_v48  ;;  %1901 = vmatprep.subr.bf16.mxu1 %v2329_v44  ;;  %v2119_v48 = vld [vmem:[#allocation8 + $0x14] ss:$8 sps:$4 sm:$0xff]  }
  0x92   :  { %647 = vmatprep.subr.bf16.mxu0 %v1996_v50  ;;  %v2122_v50 = vld [vmem:[#allocation8 + $0x24] ss:$8 sps:$4 sm:$0xff]  }
  0x94   :  { %1902 = vmatpush3.bf16.msra.mxu1 %v2032_v58  ;;  %v2134_v58 = vld [vmem:[#allocation8 + $0x64] ss:$8 sps:$4 sm:$0xff]  }
  0x95   :  { %648 = vmatpush1.bf16.msra.mxu0 %v1998_v51  ;;  %1903 = vmatprep.subr.bf16.mxu1 %v2329_v44  ;;  %v2120_v51 = vld [vmem:[#allocation8 + $0x20] ss:$8 sps:$4 sm:$0xff]  }
  0x96   :  { %649 = vmatprep.subr.bf16.mxu0 %v2001_v53  ;;  %v2123_v53 = vld [vmem:[#allocation8 + $0x30] ss:$8 sps:$4 sm:$0xff]  }
  0x98   :  { %1904 = vmatpush3.bf16.msra.mxu1 %v2036_v61  ;;  %v2135_v61 = vld [vmem:[#allocation8 + $0x70] ss:$8 sps:$4 sm:$0xff]  }
  0x99   :  { %650 = vmatpush1.bf16.msra.mxu0 %v2003_v54  ;;  %1905 = vmatprep.subr.bf16.mxu1 %v2329_v44  ;;  %v2087_v44 = vld [vmem:[#allocation7 + $0xf0] ss:$8 sps:$4 sm:$0xff]   ;;  %v2128_v54 = vld [vmem:[#allocation8 + $0x44] ss:$8 sps:$4 sm:$0xff]  }
  0x9a   :  { %662 = vmatprep.subr.bf16.mxu0 %v2011_v56  ;;  %v2131_v56 = vld [vmem:[#allocation8 + $0x54] ss:$8 sps:$4 sm:$0xff]  }
  0x9c   :  { %652 = vmatmul.mubr.bf16.vlgmr.msra.gmra.mrb[0].mxu0 %v2006_v43  ;;  %1906 = vmatpush3.bf16.msra.mxu1 %v2040_v1  ;;  %v2089_v43 = vld [vmem:[#allocation7 + $0xf4] ss:$8 sps:$4 sm:$0xff]  }
  0x9d   :  { %663 = vmatpush1.bf16.msra.mxu0 %v2009_v57  ;;  %694 = vmatprep.mubr.bf16.mxu0 %v2331_v63  ;;  %v2129_v57 = vld [vmem:[#allocation8 + $0x50] ss:$8 sps:$4 sm:$0xff]  }
  0x9e   :  { %664 = vmatprep.subr.bf16.mxu0 %v2015_v59  ;;  %1108 = vmatprep.subr.bf16.mxu1 %v2044_v3  ;;  %v2132_v59 = vld [vmem:[#allocation8 + $0x60] ss:$8 sps:$4 sm:$0xff]  }
  0x9f   :  { %1908 = vmatmul.mubr.bf16.vlgmr.msra.gmra.mrb[4].mxu1 %v2041_v6 }
  0xa0   :  { %1109 = vmatpush1.bf16.msra.mxu1 %v2042_v7  ;;  %v2141_v7 = vld [vmem:[#allocation8 + $0x90] ss:$8 sps:$4 sm:$0xff]  }
  0xa1   :  { %665 = vmatpush1.bf16.msra.mxu0 %v2013_v60  ;;  %1110 = vmatprep.subr.bf16.mxu1 %v2047_v8  ;;  %v2137_v60 = vld [vmem:[#allocation8 + $0x74] ss:$8 sps:$4 sm:$0xff]  }
  0xa2   :  { %666 = vmatprep.subr.bf16.mxu0 %v2019_v62  ;;  %v2140_v62 = vld [vmem:[#allocation8 + $0x84] ss:$8 sps:$4 sm:$0xff]  }
  0xa4   :  { %1111 = vmatpush1.bf16.msra.mxu1 %v2045_v10  ;;  %v2144_v10 = vld [vmem:[#allocation8 + $0xa0] ss:$8 sps:$4 sm:$0xff]  }
  0xa5   :  { %667 = vmatpush1.bf16.msra.mxu0 %v2017_v0  ;;  %1112 = vmatprep.subr.bf16.mxu1 %v2050_v12  ;;  %v2138_v0 = vld [vmem:[#allocation8 + $0x80] ss:$8 sps:$4 sm:$0xff]   ;;  %v2147_v12 = vld [vmem:[#allocation8 + $0xb0] ss:$8 sps:$4 sm:$0xff]  }
  0xa6   :  { %668 = vmatprep.subr.bf16.mxu0 %v2023_v2  ;;  %v2143_v2 = vld [vmem:[#allocation8 + $0x94] ss:$8 sps:$4 sm:$0xff]  }
  0xa8   :  { %1113 = vmatpush1.bf16.msra.mxu1 %v2048_v14  ;;  %v204_v14 = vlaneseq }
  0xa9   :  { %669 = vmatpush1.bf16.msra.mxu0 %v2021_v4  ;;  %1114 = vmatprep.subr.bf16.mxu1 %v2053_v16 }
  0xaa   :  { %670 = vmatprep.subr.bf16.mxu0 %v2027_v5  ;;  %v205_v16 = vshrl.u32 %v204_v14, 7 }
  0xac   :  { %1115 = vmatpush1.bf16.msra.mxu1 %v2051_v18  ;;  %v202_v18 = vld [vmem:[%s2499_s2] sm:$0x7] }
  0xad   :  { %671 = vmatpush1.bf16.msra.mxu0 %v2025_v9  ;;  %1116 = vmatprep.subr.bf16.mxu1 %v2056_v20  ;;  %v2146_v9 = vld [vmem:[#allocation8 + $0xa4] ss:$8 sps:$4 sm:$0xff]  }
  0xae   :  { %672 = vmatprep.subr.bf16.mxu0 %v2031_v11  ;;  %v2149_v11 = vld [vmem:[#allocation8 + $0xb4] ss:$8 sps:$4 sm:$0xff]  }
  0xb0   :  { %1117 = vmatpush1.bf16.msra.mxu1 %v2054_v22 }
  0xb1   :  { %673 = vmatpush1.bf16.msra.mxu0 %v2029_v13  ;;  %1118 = vmatprep.subr.bf16.mxu1 %v2059_v23  ;;  %v2152_v13 = vld [vmem:[#allocation8 + $0xc4] ss:$8 sps:$4 sm:$0xff]  }
  0xb2   :  { %674 = vmatprep.subr.bf16.mxu0 %v2035_v15  ;;  %v2150_v15 = vld [vmem:[#allocation8 + $0xc0] ss:$8 sps:$4 sm:$0xff]  }
  0xb4   :  { %1119 = vmatpush1.bf16.msra.mxu1 %v2057_v24 }
  0xb5   :  { %675 = vmatpush1.bf16.msra.mxu0 %v2033_v17  ;;  %1120 = vmatprep.subr.bf16.mxu1 %v2062_v25  ;;  %v214_v17 = vsub.s32 2, %v205_v16 }
  0xb6   :  { %676 = vmatprep.subr.bf16.mxu0 %v2039_v19 }
  0xb7   :  { %v215_v19 = vrot.slane %v202_v18, %v214_v17 }
  0xb8   :  { %1121 = vmatpush1.bf16.msra.mxu1 %v2060_v26 }
  0xb9   :  { %677 = vmatpush1.bf16.msra.mxu0 %v2037_v21  ;;  %1122 = vmatprep.subr.bf16.mxu1 %v2065_v27 }
  0xba   :  { %1412 = vmatprep.subr.bf16.mxu0 %v2116_v47 }
  0xbc   :  { %695 = vmatmul.mubr.bf16.vlgmr.msra.gmra.mrb[0].mxu0 %v2041_v6  ;;  %1123 = vmatpush1.bf16.msra.mxu1 %v2063_v28 }
  0xbd   :  { %1124 = vmatprep.subr.bf16.mxu1 %v2068_v29  ;;  %1413 = vmatpush1.bf16.msra.mxu0 %v2114_v46 }
  0xbe   :  { %1414 = vmatprep.subr.bf16.mxu0 %v2119_v48 }
  0xc0   :  { %1125 = vmatpush1.bf16.msra.mxu1 %v2066_v30 }
  0xc1   :  { %1126 = vmatprep.subr.bf16.mxu1 %v2071_v31  ;;  %1415 = vmatpush1.bf16.msra.mxu0 %v2117_v49 }
  0xc2   :  { %1416 = vmatprep.subr.bf16.mxu0 %v2122_v50 }
  0xc4   :  { %1127 = vmatpush1.bf16.msra.mxu1 %v2069_v32 }
  0xc5   :  { %1128 = vmatprep.subr.bf16.mxu1 %v2074_v33  ;;  %1417 = vmatpush1.bf16.msra.mxu0 %v2120_v51  ;;  %v2462_v33 = vsub.s32 0, %v205_v16 }
  0xc6   :  { %1418 = vmatprep.subr.bf16.mxu0 %v2125_v52 }
  0xc8   :  { %1129 = vmatpush1.bf16.msra.mxu1 %v2072_v34  ;;  %v2464_v34 = vsub.s32 1, %v205_v16 }
  0xc9   :  { %1130 = vmatprep.subr.bf16.mxu1 %v2077_v35  ;;  %1419 = vmatpush1.bf16.msra.mxu0 %v2123_v53  ;;  %v207_v35 = vrot.slane %v202_v18, %v2462_v33 }
  0xca   :  { %1420 = vmatprep.subr.bf16.mxu0 %v2128_v54 }
  0xcc   :  { %1131 = vmatpush1.bf16.msra.mxu1 %v2075_v36  ;;  %v211_v36 = vrot.slane %v202_v18, %v2464_v34 }
  0xcd   :  { %1132 = vmatprep.subr.bf16.mxu1 %v2080_v37  ;;  %1421 = vmatpush1.bf16.msra.mxu0 %v2126_v55  ;;  %v2090_v55 = vld [vmem:[#allocation7 + $0x100] ss:$8 sps:$4 sm:$0xff]  }
  0xce   :  { %1422 = vmatprep.subr.bf16.mxu0 %v2131_v56  ;;  %v2095_v56 = vld [vmem:[#allocation7 + $0x114] ss:$8 sps:$4 sm:$0xff]  }
  0xd0   :  { %1133 = vmatpush1.bf16.msra.mxu1 %v2078_v38 }
  0xd1   :  { %1134 = vmatprep.subr.bf16.mxu1 %v2083_v40  ;;  %1423 = vmatpush1.bf16.msra.mxu0 %v2129_v57  ;;  %v2093_v57 = vld [vmem:[#allocation7 + $0x110] ss:$8 sps:$4 sm:$0xff]  }
  0xd2   :  { %1424 = vmatprep.subr.bf16.mxu0 %v2134_v58  ;;  %v2098_v58 = vld [vmem:[#allocation7 + $0x124] ss:$8 sps:$4 sm:$0xff]  }
  0xd4   :  { %1135 = vmatpush1.bf16.msra.mxu1 %v2081_v39 }
  0xd5   :  { %1136 = vmatprep.subr.bf16.mxu1 %v2086_v41  ;;  %1425 = vmatpush1.bf16.msra.mxu0 %v2132_v59  ;;  %v2096_v59 = vld [vmem:[#allocation7 + $0x120] ss:$8 sps:$4 sm:$0xff]  }
  0xd6   :  { %1426 = vmatprep.subr.bf16.mxu0 %v2137_v60  ;;  %v2101_v60 = vld [vmem:[#allocation7 + $0x134] ss:$8 sps:$4 sm:$0xff]  }
  0xd8   :  { %1137 = vmatpush1.bf16.msra.mxu1 %v2084_v42 }
  0xd9   :  { %1138 = vmatprep.subr.bf16.mxu1 %v2089_v43  ;;  %1427 = vmatpush1.bf16.msra.mxu0 %v2135_v61  ;;  %v2099_v61 = vld [vmem:[#allocation7 + $0x130] ss:$8 sps:$4 sm:$0xff]  }
  0xda   :  { %1428 = vmatprep.subr.bf16.mxu0 %v2140_v62  ;;  %v2104_v62 = vld [vmem:[#allocation7 + $0x144] ss:$8 sps:$4 sm:$0xff]  }
  0xdc   :  { %1139 = vmatpush1.bf16.msra.mxu1 %v2087_v44 }
  0xdd   :  { %1151 = vmatprep.subr.bf16.mxu1 %v2092_v45  ;;  %1429 = vmatpush1.bf16.msra.mxu0 %v2138_v0  ;;  %v2102_v0 = vld [vmem:[#allocation7 + $0x140] ss:$8 sps:$4 sm:$0xff]  }
  0xde   :  { %1430 = vmatprep.subr.bf16.mxu0 %v2143_v2  ;;  %v2105_v2 = vld [vmem:[#allocation7 + $0x150] ss:$8 sps:$4 sm:$0xff]  }
  0xe1   :  { %1431 = vmatpush1.bf16.msra.mxu0 %v2141_v7  ;;  %v2153_v7 = vld [vmem:[#allocation8 + $0xd0] ss:$8 sps:$4 sm:$0xff]  }
  0xe2   :  { %1432 = vmatprep.subr.bf16.mxu0 %v2146_v9  ;;  %v2156_v9 = vld [vmem:[#allocation8 + $0xe0] ss:$8 sps:$4 sm:$0xff]  }
  0xe5   :  { %1433 = vmatpush1.bf16.msra.mxu0 %v2144_v10  ;;  %v2161_v10 = vld [vmem:[#allocation8 + $0xf4] ss:$8 sps:$4 sm:$0xff]  }
  0xe6   :  { %1434 = vmatprep.subr.bf16.mxu0 %v2149_v11  ;;  %v2159_v11 = vld [vmem:[#allocation8 + $0xf0] ss:$8 sps:$4 sm:$0xff]  }
  0xe9   :  { %1435 = vmatpush1.bf16.msra.mxu0 %v2147_v12  ;;  %v2162_v12 = vld [vmem:[#allocation10 + $0x40] sm:$0xff]  }
  0xea   :  { %1436 = vmatprep.subr.bf16.mxu0 %v2152_v13  ;;  %v856_v13 = vld [vmem:[%s2501_s4] sm:$0x3] }
  0xeb   :  { %v861_v14 = vrot.slane %v856_v13, %v2462_v33 }
  0xed   :  { %1437 = vmatpush1.bf16.msra.mxu0 %v2150_v15  ;;  %v865_v15 = vrot.slane %v856_v13, %v2464_v34 }
 0x152   :  { %v1854_v1 = vpop.f32.mrb[0].mxu1 }
 0x153   :  { %v1855_v3 = vpop.f32.mrb[1].mxu1 }
 0x154   :  { %v1856_v4 = vadd.f32 %v1855_v3, %v1854_v1  ;;  %v1857_v5 = vpop.f32.mrb[2].mxu1  ;;  %v2107_v1 = vld [vmem:[#allocation7 + $0x154] ss:$8 sps:$4 sm:$0xff]   ;;  %v2110_v3 = vld [vmem:[#allocation7 + $0x164] ss:$8 sps:$4 sm:$0xff]  }
 0x155   :  { %v1858_v6 = vpop.f32.mrb[3].mxu1 }
 0x156   :  { %v1859_v8 = vadd.f32 %v1858_v6, %v1857_v5  ;;  %v740_v20 = vadd.f32 %v1856_v4, %v215_v19  ;;  %v2113_v4 = vld [vmem:[#allocation7 + $0x174] ss:$8 sps:$4 sm:$0xff]   ;;  %v2111_v5 = vld [vmem:[#allocation7 + $0x170] ss:$8 sps:$4 sm:$0xff]  }
 0x157   :  { %v2155_v6 = vld [vmem:[#allocation8 + $0xd4] ss:$8 sps:$4 sm:$0xff]  }
 0x158   :  { %v743_v21 = vadd.f32 %v1859_v8, %v215_v19  ;;  %1438 = vmatprep.subr.bf16.mxu0 %v2155_v6  ;;  %v2158_v8 = vld [vmem:[#allocation8 + $0xe4] ss:$8 sps:$4 sm:$0xff]  }
 0x159   :  { %1439 = vmatpush1.bf16.msra.mxu0 %v2153_v7  ;;  %v1821_v7 = vld [vmem:[%s2505_s8] ss:$0 sm:$0xff] }
 0x15a   :  { %1440 = vmatprep.subr.bf16.mxu0 %v2158_v8 }
 0x15d   :  { %1441 = vmatpush1.bf16.msra.mxu0 %v2156_v9 }
 0x15e   :  { %1442 = vmatprep.subr.bf16.mxu0 %v2161_v10 }
 0x161   :  { %1443 = vmatpush1.bf16.msra.mxu0 %v2159_v11 }
 0x162   :  { %1869 = vmatprep.subr.bf16.mxu0 %v2162_v12 }
 0x172   :  { %v780_v22 = vpop.f32.mrb[4].mxu1 }
 0x173   :  { %v781_v23 = vadd.f32 %v780_v22, %v740_v20  ;;  %v1909_v24 = vpop.f32.mrb[5].mxu1 }
 0x174   :  { %v783_v25 = vpop.f32.mrb[6].mxu1 }
 0x175   :  { %vm789_vm1 = vcmp.ge.f32.partialorder %v781_v23, 0.0  ;;  %v795_v26 = vmul.f32 0.05, %v781_v23  ;;  %v784_v27 = vadd.f32 %v783_v25, %v743_v21  ;;  %v1910_v28 = vpop.f32.mrb[7].mxu1 }
 0x177   :  { %v2459_v29 = vsel %vm789_vm1, %v781_v23, %v795_v26  ;;  %vm792_vm2 = vcmp.ge.f32.partialorder %v784_v27, 0.0  ;;  %v798_v30 = vmul.f32 0.05, %v784_v27 }
 0x179   :  { %v804_v31 = vsel %vm792_vm2, %v784_v27, %v798_v30 }
 0x17a   :  { %v807_v32 = vpack.c.bf16 %v804_v31, %v2459_v29 }
 0x18f   :  { %v696_v37 = vpop.f32.mrb[0].mxu0 }
 0x190   :  { %v1911_v38 = vadd.f32 %v696_v37, %v207_v35  ;;  %v698_v39 = vpop.f32.mrb[1].mxu0  ;;  %v2164_v37 = vld [vmem:[#allocation10 + $0x48] sm:$0xff]  }
 0x191   :  { %v1912_v40 = vadd.f32 %v698_v39, %v211_v36  ;;  %v700_v41 = vpop.f32.mrb[2].mxu0  ;;  %v2166_v39 = vld [vmem:[#allocation10 + $0x50] sm:$0xff]  }
 0x192   :  { %v793_v42 = vmul.f32 0.05, %v1911_v38  ;;  %v1913_v43 = vadd.f32 %v700_v41, %v207_v35  ;;  %v702_v44 = vpop.f32.mrb[3].mxu0  ;;  %vm787_vm3 = vcmp.ge.f32.partialorder %v1911_v38, 0.0  ;;  %v2168_v41 = vld [vmem:[#allocation10 + $0x58] sm:$0xff]  }
 0x193   :  { %v794_v45 = vmul.f32 0.05, %v1912_v40  ;;  %v1914_v46 = vadd.f32 %v702_v44, %v211_v36  ;;  %vm788_vm4 = vcmp.ge.f32.partialorder %v1912_v40, 0.0  ;;  %v2163_v36 = vld [vmem:[#allocation10] sm:$0xff]  }
 0x194   :  { %vm790_vm5 = vcmp.ge.f32.partialorder %v1913_v43, 0.0  ;;  %v796_v47 = vmul.f32 0.05, %v1913_v43  ;;  %v799_v49 = vsel %vm787_vm3, %v1911_v38, %v793_v42  ;;  %v2165_v38 = vld [vmem:[#allocation10 + $0x8] sm:$0xff]   ;;  %v2169_v42 = vld [vmem:[#allocation10 + $0x18] sm:$0xff]   ;;  %v2171_v44 = vld [vmem:[#allocation10 + $0x20] sm:$0xff]  }
 0x195   :  { %vm791_vm6 = vcmp.ge.f32.partialorder %v1914_v46, 0.0  ;;  %v797_v48 = vmul.f32 0.05, %v1914_v46  ;;  %v800_v52 = vsel %vm788_vm4, %v1912_v40, %v794_v45  ;;  %v2167_v40 = vld [vmem:[#allocation10 + $0x10] sm:$0xff]   ;;  %v2172_v45 = vld [vmem:[#allocation10 + $0x68] sm:$0xff]  }
 0x196   :  { %v802_v50 = vsel %vm790_vm5, %v1913_v43, %v796_v47  ;;  %v2170_v43 = vld [vmem:[#allocation10 + $0x60] sm:$0xff]   ;;  %v2174_v47 = vld [vmem:[#allocation10 + $0x70] sm:$0xff]  }
 0x197   :  { %v805_v51 = vpack.c.bf16 %v802_v50, %v799_v49  ;;  %v803_v53 = vsel %vm791_vm6, %v1914_v46, %v797_v48  ;;  %v2173_v46 = vld [vmem:[#allocation10 + $0x28] sm:$0xff]   ;;  %v2175_v48 = vld [vmem:[#allocation10 + $0x30] sm:$0xff]   ;;  %v2176_v49 = vld [vmem:[#allocation10 + $0x78] sm:$0xff]  }
 0x198   :  { %v806_v54 = vpack.c.bf16 %v803_v53, %v800_v52  ;;  %v2177_v50 = vld [vmem:[#allocation10 + $0x38] sm:$0xff]  }
 0x19a   :  { %1140 = vmatprep.mubr.bf16.mxu1 %v806_v54 }
 0x19b   :  { %1141 = vmatmul.mubr.bf16.vlgmr.msra.gmra.mrb[8].mxu1 %v805_v51  ;;  %v1240_v51 = vld [vmem:[%s2503_s6] sm:$0x3] }
 0x19c   :  { %1152 = vmatpush1.bf16.msra.mxu1 %v2090_v55  ;;  %1183 = vmatprep.mubr.bf16.mxu1 %v2331_v63  ;;  %v2108_v63 = vld [vmem:[#allocation7 + $0x160] ss:$8 sps:$4 sm:$0xff]   ;;  %v1245_v52 = vrot.slane %v1240_v51, %v2462_v33  ;;  %v1249_v53 = vrot.slane %v1240_v51, %v2464_v34 }
 0x19d   :  { %1153 = vmatprep.subr.bf16.mxu1 %v2095_v56 }
 0x1a0   :  { %1154 = vmatpush1.bf16.msra.mxu1 %v2093_v57 }
 0x1a1   :  { %1155 = vmatprep.subr.bf16.mxu1 %v2098_v58 }
 0x1a4   :  { %1156 = vmatpush1.bf16.msra.mxu1 %v2096_v59 }
 0x1a5   :  { %1157 = vmatprep.subr.bf16.mxu1 %v2101_v60 }
 0x1a8   :  { %1158 = vmatpush1.bf16.msra.mxu1 %v2099_v61 }
 0x1a9   :  { %1159 = vmatprep.subr.bf16.mxu1 %v2104_v62 }
 0x1ac   :  { %1160 = vmatpush1.bf16.msra.mxu1 %v2102_v0 }
 0x1ad   :  { %1161 = vmatprep.subr.bf16.mxu1 %v2107_v1 }
 0x1b0   :  { %1162 = vmatpush1.bf16.msra.mxu1 %v2105_v2 }
 0x1b1   :  { %1163 = vmatprep.subr.bf16.mxu1 %v2110_v3 }
 0x1b4   :  { %1164 = vmatpush1.bf16.msra.mxu1 %v2108_v63 }
 0x1b5   :  { %1165 = vmatprep.subr.bf16.mxu1 %v2113_v4 }
 0x1b8   :  { %1166 = vmatpush1.bf16.msra.mxu1 %v2111_v5 }
 0x1bb   :  { %1184 = vmatmul.mubr.bf16.vlgmr.msra.gmra.mrb[8].mxu1 %v807_v32 }
 0x28e   :  { %v1185_v16 = vpop.f32.mrb[8].mxu1 }
 0x28f   :  { %v1915_v17 = vadd.f32 %v1185_v16, %v861_v14  ;;  %v1187_v18 = vpop.f32.mrb[9].mxu1 }
 0x290   :  { %v1916_v19 = vadd.f32 %v1187_v18, %v865_v15  ;;  %v1189_v20 = vpop.f32.mrb[10].mxu1 }
 0x291   :  { %v1198_v21 = vmul.f32 0.05, %v1915_v17  ;;  %v1917_v22 = vadd.f32 %v1189_v20, %v861_v14  ;;  %v1191_v23 = vpop.f32.mrb[11].mxu1  ;;  %vm1194_vm7 = vcmp.ge.f32.partialorder %v1915_v17, 0.0 }
 0x292   :  { %v1199_v24 = vmul.f32 0.05, %v1916_v19  ;;  %v1918_v25 = vadd.f32 %v1191_v23, %v865_v15  ;;  %vm1195_vm8 = vcmp.ge.f32.partialorder %v1916_v19, 0.0 }
 0x293   :  { %vm1196_vm9 = vcmp.ge.f32.partialorder %v1917_v22, 0.0  ;;  %v1200_v26 = vmul.f32 0.05, %v1917_v22  ;;  %v1202_v28 = vsel %vm1194_vm7, %v1915_v17, %v1198_v21 }
 0x294   :  { %vm1197_vm10 = vcmp.ge.f32.partialorder %v1918_v25, 0.0  ;;  %v1201_v27 = vmul.f32 0.05, %v1918_v25  ;;  %v1203_v31 = vsel %vm1195_vm8, %v1916_v19, %v1199_v24 }
 0x295   :  { %v1204_v29 = vsel %vm1196_vm9, %v1917_v22, %v1200_v26 }
 0x296   :  { %v1206_v30 = vpack.c.bf16 %v1204_v29, %v1202_v28  ;;  %v1205_v32 = vsel %vm1197_vm10, %v1918_v25, %v1201_v27 }
 0x297   :  { %v1207_v35 = vpack.c.bf16 %v1205_v32, %v1203_v31 }
 0x299   :  { %1444 = vmatprep.mubr.bf16.mxu0 %v1207_v35 }
 0x29a   :  { %1445 = vmatmul.mubr.bf16.vlgmr.msra.gmra.mrb[4].mxu0 %v1206_v30 }
 0x29b   :  { %1870 = vmatpush3.bf16.msra.mxu0 %v2163_v36 }
 0x29c   :  { %1871 = vmatprep.subr.bf16.mxu0 %v2164_v37 }
 0x29f   :  { %1872 = vmatpush3.bf16.msra.mxu0 %v2165_v38 }
 0x2a0   :  { %1873 = vmatprep.subr.bf16.mxu0 %v2166_v39 }
 0x2a3   :  { %1874 = vmatpush3.bf16.msra.mxu0 %v2167_v40 }
 0x2a4   :  { %1875 = vmatprep.subr.bf16.mxu0 %v2168_v41 }
 0x2a7   :  { %1876 = vmatpush3.bf16.msra.mxu0 %v2169_v42 }
 0x2a8   :  { %1877 = vmatprep.subr.bf16.mxu0 %v2170_v43 }
 0x2ab   :  { %1878 = vmatpush3.bf16.msra.mxu0 %v2171_v44 }
 0x2ac   :  { %1879 = vmatprep.subr.bf16.mxu0 %v2172_v45 }
 0x2af   :  { %1880 = vmatpush3.bf16.msra.mxu0 %v2173_v46 }
 0x2b0   :  { %1881 = vmatprep.subr.bf16.mxu0 %v2174_v47 }
 0x2b3   :  { %1882 = vmatpush3.bf16.msra.mxu0 %v2175_v48 }
 0x2b4   :  { %1883 = vmatprep.subr.bf16.mxu0 %v2176_v49 }
 0x2b7   :  { %1884 = vmatpush3.bf16.msra.mxu0 %v2177_v50 }
 0x36d   :  { %v1446_v54 = vpop.f32.mrb[4].mxu0 }
 0x36e   :  { %v1447_v55 = vadd.f32 %v1446_v54, %v1245_v52  ;;  %v1448_v56 = vpop.f32.mrb[5].mxu0 }
 0x36f   :  { %v1449_v57 = vadd.f32 %v1448_v56, %v1249_v53  ;;  %v1450_v58 = vpop.f32.mrb[6].mxu0 }
 0x370   :  { %v1459_v59 = vmul.f32 0.05, %v1447_v55  ;;  %v1451_v60 = vadd.f32 %v1450_v58, %v1245_v52  ;;  %v1452_v61 = vpop.f32.mrb[7].mxu0  ;;  %vm1455_vm11 = vcmp.ge.f32.partialorder %v1447_v55, 0.0 }
 0x371   :  { %v1460_v62 = vmul.f32 0.05, %v1449_v57  ;;  %v1453_v0 = vadd.f32 %v1452_v61, %v1249_v53  ;;  %vm1456_vm12 = vcmp.ge.f32.partialorder %v1449_v57, 0.0 }
 0x372   :  { %vm1457_vm13 = vcmp.ge.f32.partialorder %v1451_v60, 0.0  ;;  %v1461_v1 = vmul.f32 0.05, %v1451_v60  ;;  %v1463_v3 = vsel %vm1455_vm11, %v1447_v55, %v1459_v59 }
 0x373   :  { %vm1458_vm14 = vcmp.ge.f32.partialorder %v1453_v0, 0.0  ;;  %v1462_v2 = vmul.f32 0.05, %v1453_v0  ;;  %v1464_v34 = vsel %vm1456_vm12, %v1449_v57, %v1460_v62 }
 0x374   :  { %v1465_v33 = vsel %vm1457_vm13, %v1451_v60, %v1461_v1 }
 0x375   :  { %v1467_v63 = vpack.c.bf16 %v1465_v33, %v1463_v3  ;;  %v1466_v4 = vsel %vm1458_vm14, %v1453_v0, %v1462_v2 }
 0x376   :  { %v1468_v5 = vpack.c.bf16 %v1466_v4, %v1464_v34 }
 0x378   :  { %1636 = vmatprep.mubr.bf16.mxu0 %v1468_v5 }
 0x379   :  { %1637 = vmatmul.mubr.bf16.vlgmr.msra.gmra.mrb[8].mxu0 %v1467_v63 }
 0x44c   :  { %v1885_v6 = vpop.f32.mrb[8].mxu0 }
 0x44d   :  { %v1886_v8 = vpop.f32.mrb[9].mxu0 }
 0x44e   :  { %v1887_v9 = vadd.f32 %v1886_v8, %v1885_v6  ;;  %v1888_v10 = vpop.f32.mrb[10].mxu0 }
 0x44f   :  { %v1889_v11 = vpop.f32.mrb[11].mxu0 }
 0x450   :  { %v1639_v12 = vadd.f32 %v1887_v9, %v1821_v7  ;;  %v1890_v13 = vadd.f32 %v1889_v11, %v1888_v10 }
 0x452   :  { %1645 = vst [vmem:[#allocation11] sm:$0xff] %v1639_v12  ;;  %v1642_v14 = vadd.f32 %v1890_v13, %v1821_v7 }
 0x454   :  { %1646 = vst [vmem:[#allocation11 + $0x8] sm:$0xff] %v1642_v14 }
 0x455   :  { %2299 = shalt.err (!%p2296_p2)
}
 0x456   :  { %s2300_s0 = scalar_lea.hbm %s2506_s9, 256 }
 0x457   :  { %p2301_p3 = scmp.ne.s32.totalorder %s2506_s9, %s2300_s0  ;;  %p2304_p4 = scmp.lt.u32.totalorder %s2300_s0, %s2506_s9 }
 0x459   :  { %p2306_p5 = pnand %p2304_p4, %p2301_p3 }
 0x45b   :  { %2309 = shalt.err (!%p2306_p5)
}
 0x45c   :  { %1658 = dma.vmem_to_hbm [thread:$0]  %s1653_s17, 256, %s2506_s9, [#allocation4], %s2323_s10, %s2323_s10, %s2324_s14  }
 0x45d   :  { %2316 = dma.done.wait [#allocation4], 256  }
 0x45e   :  { %2317 = vsyncadd [#allocation4], 4294967040 }
 0x45f   :  { %1662 = vsyncpa [#allocation3], 1 }
 0x460   :  { %1663 = vsyncpa [#allocation6], 1 }
 0x461   :  { %1664 = vsyncpa [#allocation9], 1 }
 0x462   :  { %1665 = vsyncpa [#allocation4], 1 }

</bundles_post_ra>
